<compile_context>
chip_gen: v7x
topology: tpu7x:2x2x1
jax: 0.10.0
libtpu: 0.0.40
codegen_flags: <defaults>
</compile_context>

<pallas_src>
from functools import partial

import jax
import jax.numpy as jnp
from jax.experimental import pallas as pl
from jax.experimental.pallas import tpu as pltpu

F32 = jnp.float32
_NEG_BIG = -1e30      # additive adjacency mask value / online-softmax init


# ----------------------------------------------------------------------------
# Generation-aware configuration.
# ----------------------------------------------------------------------------
def _detect_config():
    vmem = 0
    try:
        info = pltpu.get_tpu_info()
        vmem = int(getattr(info, "vmem_capacity_bytes", 0) or 0)
    except Exception:
        vmem = 0
    if vmem >= 100 * 1024 * 1024:           # v5e / v6e: 128 MiB VMEM, 1 TC
        return dict(row_tile=512, vmem_limit=96 * 1024 * 1024,
                    single_buffer_residents=False, split_for_megacore=False)
    if vmem > 0:                             # v7x: 64 MiB VMEM, 2 TC / chip
        return dict(row_tile=256, vmem_limit=32 * 1024 * 1024,
                    single_buffer_residents=True, split_for_megacore=True)
    # Unknown backend (e.g. interpret mode): conservative defaults, still
    # exercise multi-step grids.
    return dict(row_tile=256, vmem_limit=32 * 1024 * 1024,
                single_buffer_residents=False, split_for_megacore=True)


_CFG = _detect_config()


def _round_up(x, m):
    return ((x + m - 1) // m) * m


def _row_tile(n):
    tm = n if n <= _CFG["row_tile"] else _CFG["row_tile"]
    # v7x megacore: guarantee >= 2 grid steps on the "parallel" row axis.
    if _CFG["split_for_megacore"] and n > 16 and pl.cdiv(n, tm) == 1:
        tm = min(n, _round_up(pl.cdiv(n, 2), 8))
    return tm


def _src_tile(n):
    # Streamed softmax-reduction axis: the tile must divide n exactly so no
    # padded garbage columns enter the online softmax.
    t = _CFG["row_tile"]
    if n <= t or n % t:
        # TODO(synk): pad N to a tile multiple (or mask padded source columns
        # in-kernel) so non-multiple graphs can also stream the source axis.
        return n
    return t


def _cparams(n_parallel, n_arbitrary=0):
    return pltpu.CompilerParams(
        dimension_semantics=("parallel",) * n_parallel
        + ("arbitrary",) * n_arbitrary,
        vmem_limit_bytes=_CFG["vmem_limit"])


def _const_spec(shape):
    # Resident operand (same block for every grid step).  On v7x, single
    # buffer it so the constant blocks do not burn double-buffer VMEM.
    zeros = (0,) * len(shape)
    kwargs = {}
    if _CFG["single_buffer_residents"]:
        kwargs["pipeline_mode"] = pl.Buffered(1)
    return pl.BlockSpec(shape, lambda *_: zeros, **kwargs)


# ----------------------------------------------------------------------------
# Kernel 1: row-tiled linear + bias + activation (node_lin / net_lin / pin_lin)
# ----------------------------------------------------------------------------
def _linear_kernel(x_ref, w_ref, b_ref, o_ref, *, act):
    y = jnp.dot(x_ref[...], w_ref[...],
                preferred_element_type=jnp.float32) + b_ref[...]
    if act == "leaky_relu":            # F.leaky_relu default slope 0.01
        y = jnp.where(y >= 0, y, 0.01 * y)
    elif act == "tanh":
        y = jnp.tanh(y)
    o_ref[...] = y


def linear(x, w, b, act=None):
    m, k = x.shape
    n = w.shape[1]
    tm = _row_tile(m)
    return pl.pallas_call(
        partial(_linear_kernel, act=act),
        out_shape=jax.ShapeDtypeStruct((m, n), F32),
        grid=(pl.cdiv(m, tm),),
        in_specs=[pl.BlockSpec((tm, k), lambda i: (i, 0)),
                  _const_spec((k, n)),
                  _const_spec((1, n))],
        out_specs=pl.BlockSpec((tm, n), lambda i: (i, 0)),
        compiler_params=_cparams(1),
    )(x, w, b.reshape(1, -1))


# ----------------------------------------------------------------------------
# Kernel 2a: GraphConv hoisted projection  xw = (norm_src * x) @ W   (once)
# Kernel 2b: GraphConv aggregation         out = tanh((B @ xw) * norm_dst + b)
# ----------------------------------------------------------------------------
def _scaled_linear_kernel(x_ref, s_ref, w_ref, o_ref):
    o_ref[...] = jnp.dot(x_ref[...] * s_ref[...], w_ref[...],
                         preferred_element_type=jnp.float32)


def scaled_linear(x, scale, w):
    m, k = x.shape
    n = w.shape[1]
    tm = _row_tile(m)
    return pl.pallas_call(
        _scaled_linear_kernel,
        out_shape=jax.ShapeDtypeStruct((m, n), F32),
        grid=(pl.cdiv(m, tm),),
        in_specs=[pl.BlockSpec((tm, k), lambda i: (i, 0)),
                  pl.BlockSpec((tm, 1), lambda i: (i, 0)),
                  _const_spec((k, n))],
        out_specs=pl.BlockSpec((tm, n), lambda i: (i, 0)),
        compiler_params=_cparams(1),
    )(x, scale, w)


def _graph_agg_kernel(b_ref, xw_ref, nd_ref, bias_ref, o_ref):
    agg = jnp.dot(b_ref[...], xw_ref[...], preferred_element_type=jnp.float32)
    o_ref[...] = jnp.tanh(agg * nd_ref[...] + bias_ref[...])


def graph_aggregate(b_inc, xw, norm_dst, bias):
    n_net, n_node = b_inc.shape
    out_f = xw.shape[1]
    tm = _row_tile(n_net)
    return pl.pallas_call(
        _graph_agg_kernel,
        out_shape=jax.ShapeDtypeStruct((n_net, out_f), F32),
        grid=(pl.cdiv(n_net, tm),),
        in_specs=[pl.BlockSpec((tm, n_node), lambda i: (i, 0)),
                  _const_spec((n_node, out_f)),
                  pl.BlockSpec((tm, 1), lambda i: (i, 0)),
                  _const_spec((1, out_f))],
        out_specs=pl.BlockSpec((tm, out_f), lambda i: (i, 0)),
        compiler_params=_cparams(1),
    )(b_inc, xw, norm_dst, bias.reshape(1, -1))


# ----------------------------------------------------------------------------
# Kernel 3a: NNConv per-edge messages (grid over pin edges E):
#   src_e = G_e @ net ; msg_e = [pin_e (x) src_e] @ W2_kr + src_e @ B2
# Kernel 3b: mean aggregation over incoming edges + bias + tanh.
# ----------------------------------------------------------------------------
def _edge_message_kernel(g_ref, pin_ref, net_ref, w2_ref, b2_ref, o_ref,
                         *, n_pin_feats):
    src = jnp.dot(g_ref[...], net_ref[...],
                  preferred_element_type=jnp.float32)              # (Te, Hn)
    pin = pin_ref[...]                                             # (Te, P)
    # Khatri-Rao product, lane order p*Hn + h (matches W2_kr row order).
    kr = jnp.concatenate([pin[:, p:p + 1] * src
                          for p in range(n_pin_feats)], axis=-1)   # (Te, P*Hn)
    msg = jnp.dot(kr, w2_ref[...], preferred_element_type=jnp.float32)
    msg = msg + jnp.dot(src, b2_ref[...],
                        preferred_element_type=jnp.float32)        # lin2 bias
    o_ref[...] = msg


def edge_messages(g_gather, pin_feat, net_feat, w2_kr, b2_mat):
    n_pin, n_net = g_gather.shape
    p_dim = pin_feat.shape[1]
    hn = net_feat.shape[1]
    out_f = w2_kr.shape[1]
    te = _row_tile(n_pin)
    return pl.pallas_call(
        partial(_edge_message_kernel, n_pin_feats=p_dim),
        out_shape=jax.ShapeDtypeStruct((n_pin, out_f), F32),
        grid=(pl.cdiv(n_pin, te),),
        in_specs=[pl.BlockSpec((te, n_net), lambda i: (i, 0)),
                  pl.BlockSpec((te, p_dim), lambda i: (i, 0)),
                  _const_spec((n_net, hn)),
                  _const_spec((p_dim * hn, out_f)),
                  _const_spec((hn, out_f))],
        out_specs=pl.BlockSpec((te, out_f), lambda i: (i, 0)),
        compiler_params=_cparams(1),
    )(g_gather, pin_feat, net_feat, w2_kr, b2_mat)


def _mean_agg_kernel(agg_ref, msg_ref, bias_ref, o_ref):
    out = jnp.dot(agg_ref[...], msg_ref[...],
                  preferred_element_type=jnp.float32)
    o_ref[...] = jnp.tanh(out + bias_ref[...])


def mean_aggregate(agg, msg, bias):
    n_node, n_pin = agg.shape
    out_f = msg.shape[1]
    tm = _row_tile(n_node)
    return pl.pallas_call(
        _mean_agg_kernel,
        out_shape=jax.ShapeDtypeStruct((n_node, out_f), F32),
        grid=(pl.cdiv(n_node, tm),),
        in_specs=[pl.BlockSpec((tm, n_pin), lambda i: (i, 0)),
                  _const_spec((n_pin, out_f)),
                  _const_spec((1, out_f))],
        out_specs=pl.BlockSpec((tm, out_f), lambda i: (i, 0)),
        compiler_params=_cparams(1),
    )(agg, msg, bias.reshape(1, -1))


# ----------------------------------------------------------------------------
# Kernel 4a: hoisted GAT projection (once per layer): zf = x@fc, el, er.
# Kernel 4b: flash-streamed multi-channel GAT + bias + tanh + concat with the
#            NodeNet node output, writing the (N, hidden_node) slab directly.
# ----------------------------------------------------------------------------
def _gat_project_kernel(x_ref, fcw_ref, al_ref, ar_ref, zf_ref, el_ref, er_ref):
    z = jnp.dot(x_ref[...], fcw_ref[...], preferred_element_type=jnp.float32)
    zf_ref[...] = z
    el_ref[...] = jnp.dot(z, al_ref[...], preferred_element_type=jnp.float32)
    er_ref[...] = jnp.dot(z, ar_ref[...], preferred_element_type=jnp.float32)


def gat_project(x, fc_w, al_mat, ar_mat):
    n, dn = x.shape
    hf = fc_w.shape[1]
    heads = al_mat.shape[1]
    tm = _row_tile(n)
    return pl.pallas_call(
        _gat_project_kernel,
        out_shape=(jax.ShapeDtypeStruct((n, hf), F32),
                   jax.ShapeDtypeStruct((n, heads), F32),
                   jax.ShapeDtypeStruct((n, heads), F32)),
        grid=(pl.cdiv(n, tm),),
        in_specs=[pl.BlockSpec((tm, dn), lambda i: (i, 0)),
                  _const_spec((dn, hf)),
                  _const_spec((hf, heads)),
                  _const_spec((hf, heads))],
        out_specs=(pl.BlockSpec((tm, hf), lambda i: (i, 0)),
                   pl.BlockSpec((tm, heads), lambda i: (i, 0)),
                   pl.BlockSpec((tm, heads), lambda i: (i, 0))),
        compiler_params=_cparams(1),
    )(x, fc_w, al_mat, ar_mat)


def _gat_stream_kernel(er_ref, elT_ref, zsrc_ref, mask_ref, bias_ref, part_ref,
                       o_ref, m_sc, l_sc, acc_sc, *, heads, fg, channels):
    k = pl.program_id(1)
    nk = pl.num_programs(1)

    @pl.when(k == 0)
    def _():
        m_sc[...] = jnp.full(m_sc.shape, _NEG_BIG, dtype=F32)
        l_sc[...] = jnp.zeros(l_sc.shape, dtype=F32)
        acc_sc[...] = jnp.zeros(acc_sc.shape, dtype=F32)

    er = er_ref[...]            # (Tm, H)    destination attention terms
    elT = elT_ref[...]          # (H, Ts)    source attention terms
    zsrc = zsrc_ref[...]        # (Ts, H*Fg) projected source features
    mask = mask_ref[...]        # (C, Tm, Ts) additive 0 / -1e30

    for c in range(channels):
        mb = mask[c]
        for h in range(heads):
            idx = h * channels + c                 # torch cat order h*C + c
            off = idx * fg
            e = er[:, h:h + 1] + elT[h:h + 1, :]   # (Tm, Ts)
            e = jnp.where(e >= 0, e, 0.2 * e)      # GAT leaky_relu(0.2)
            e = e + mb                             # additive adjacency mask
            m_prev = m_sc[:, idx:idx + 1]
            m_new = jnp.maximum(m_prev, jnp.max(e, axis=-1, keepdims=True))
            corr = jnp.exp(m_prev - m_new)
            p = jnp.exp(e - m_new)                 # masked entries underflow->0
            l_sc[:, idx:idx + 1] = (corr * l_sc[:, idx:idx + 1]
                                    + jnp.sum(p, axis=-1, keepdims=True))
            acc_sc[:, off:off + fg] = (
                corr * acc_sc[:, off:off + fg]
                + jnp.dot(p, zsrc[:, h * fg:(h + 1) * fg],
                          preferred_element_type=jnp.float32))
            m_sc[:, idx:idx + 1] = m_new

    @pl.when(k == nk - 1)
    def _():
        bias = bias_ref[...]                        # (1, H*Fg)
        pieces = [None] * (heads * channels)
        for c in range(channels):
            for h in range(heads):
                idx = h * channels + c
                off = idx * fg
                inv = pl.reciprocal(jnp.maximum(l_sc[:, idx:idx + 1], 1e-20),
                                    approx=True)
                pieces[idx] = jnp.tanh(acc_sc[:, off:off + fg] * inv
                                       + bias[:, h * fg:(h + 1) * fg])
        # fused epilogue: [grid features || NodeNet node features], all tanh'd.
        o_ref[...] = jnp.concatenate(pieces + [part_ref[...]], axis=-1)


def gat_layer(zf, el_t, er, mask_bias, gat_bias, node_part,
              *, heads, fg, channels):
    n_node, hf = zf.shape
    on = node_part.shape[1]
    hidden = channels * hf + on
    tm = _row_tile(n_node)
    ts = _src_tile(n_node)
    return pl.pallas_call(
        partial(_gat_stream_kernel, heads=heads, fg=fg, channels=channels),
        out_shape=jax.ShapeDtypeStruct((n_node, hidden), F32),
        grid=(pl.cdiv(n_node, tm), pl.cdiv(n_node, ts)),
        in_specs=[pl.BlockSpec((tm, heads), lambda i, k: (i, 0)),      # er
                  pl.BlockSpec((heads, ts), lambda i, k: (0, k)),      # elT
                  pl.BlockSpec((ts, hf), lambda i, k: (k, 0)),         # zf src
                  pl.BlockSpec((channels, tm, ts),
                               lambda i, k: (0, i, k)),                # mask
                  _const_spec((1, hf)),                                # bias
                  pl.BlockSpec((tm, on), lambda i, k: (i, 0))],        # NodeNet
        out_specs=pl.BlockSpec((tm, hidden), lambda i, k: (i, 0)),
        scratch_shapes=[pltpu.VMEM((tm, channels * heads), F32),       # m
                        pltpu.VMEM((tm, channels * heads), F32),       # l
                        pltpu.VMEM((tm, channels * heads * fg), F32)], # acc
        compiler_params=_cparams(1, 1),
    )(er, el_t, zf, mask_bias, gat_bias, node_part)


# ----------------------------------------------------------------------------
# Kernel 5: fused output head.  cat([in_node, node_feat]) folded into two
# matmuls; out1 -> tanh -> out2 -> tanh -> out3 -> sigmoid/tanh in one kernel.
# ----------------------------------------------------------------------------
def _head_kernel(xin_ref, xh_ref, w1a_ref, w1b_ref, b1_ref, w2_ref, b2_ref,
                 w3_ref, b3_ref, o_ref, *, act):
    h = (jnp.dot(xin_ref[...], w1a_ref[...],
                 preferred_element_type=jnp.float32)
         + jnp.dot(xh_ref[...], w1b_ref[...],
                   preferred_element_type=jnp.float32)
         + b1_ref[...])
    h = jnp.tanh(h)
    h = jnp.tanh(jnp.dot(h, w2_ref[...],
                         preferred_element_type=jnp.float32) + b2_ref[...])
    y = jnp.dot(h, w3_ref[...], preferred_element_type=jnp.float32) + b3_ref[...]
    if act == "sig":
        y = jax.nn.sigmoid(y)
    elif act == "tanh":
        y = jnp.tanh(y)
    o_ref[...] = y


def output_head(in_node, node_feat, w1a, w1b, b1, w2, b2, w3, b3, act):
    m, fin = in_node.shape
    dn = node_feat.shape[1]
    hid = w1a.shape[1]
    nt = w3.shape[1]
    tm = _row_tile(m)
    return pl.pallas_call(
        partial(_head_kernel, act=act),
        out_shape=jax.ShapeDtypeStruct((m, nt), F32),
        grid=(pl.cdiv(m, tm),),
        in_specs=[pl.BlockSpec((tm, fin), lambda i: (i, 0)),
                  pl.BlockSpec((tm, dn), lambda i: (i, 0)),
                  _const_spec((fin, hid)),
                  _const_spec((dn, hid)),
                  _const_spec((1, hid)),
                  _const_spec((hid, hid)),
                  _const_spec((1, hid)),
                  _const_spec((hid, nt)),
                  _const_spec((1, nt))],
        out_specs=pl.BlockSpec((tm, nt), lambda i: (i, 0)),
        compiler_params=_cparams(1),
    )(in_node, node_feat, w1a, w1b, b1.reshape(1, -1), w2, b2.reshape(1, -1),
      w3, b3.reshape(1, -1))


# ----------------------------------------------------------------------------
# Parameter init (deterministic, synthetic) — also pre-builds the derived
# matrices used by the fused kernels (block-diag attention, Khatri-Rao lin2,
# split output-layer-1 weight) so the forward has no per-call reshapes.
# ----------------------------------------------------------------------------
def _block_diag_attn(a):
    # (H, Fg) attention vector -> (H*Fg, H) block-diagonal matrix so that
    # el = z @ A is one MXU matmul with z kept in its (N, H*Fg) lane layout.
    h, fg = a.shape
    eye = jnp.eye(h, dtype=F32)
    return (a[:, :, None] * eye[:, None, :]).reshape(h * fg, h)


def init_params(key, cfg, in_node_feats, in_net_feats, in_pin_feats, n_target,
                activation="sig"):
    H, Fg, C = cfg["GRID_HEADS"], cfg["GRID_FEATS"], cfg["GRID_CHANNELS"]
    out_node, out_net = cfg["NODE_FEATS"], cfg["NET_FEATS"]
    hidden_node = out_node + Fg * C * H
    hidden_net = out_net
    hidden_pin = cfg["PIN_FEATS"]

    keys = iter(jax.random.split(key, 128))

    def lin(fi, fo):
        w = jax.random.normal(next(keys), (fi, fo), F32) / jnp.sqrt(
            jnp.asarray(fi, F32))
        b = jax.random.normal(next(keys), (fo,), F32) * 0.05
        return (w, b)

    params = {
        "n_layer": cfg["N_LAYER"],
        "grid_heads": H, "grid_feats": Fg, "grid_channels": C,
        "hidden_node": hidden_node, "hidden_net": hidden_net,
        "hidden_pin": hidden_pin, "out_node": out_node, "out_net": out_net,
        "activation": activation,
        "node_lin": lin(in_node_feats, hidden_node),
        "net_lin": lin(in_net_feats, hidden_net),
        "pin_lin": lin(in_pin_feats, hidden_pin),
        "layers": [],
    }
    w1, b1 = lin(in_node_feats + hidden_node, hidden_node)
    params["out1a"], params["out1b"], params["out1_b"] = (
        w1[:in_node_feats], w1[in_node_feats:], b1)
    params["out2"] = lin(hidden_node, hidden_node)
    params["out3"] = lin(hidden_node, n_target)

    for _ in range(cfg["N_LAYER"]):
        attn_l = jax.random.normal(next(keys), (H, Fg), F32) * 0.3
        attn_r = jax.random.normal(next(keys), (H, Fg), F32) * 0.3
        w2, b2 = lin(hidden_pin, hidden_net * out_node)
        lp = {
            "gat_fc_w": jax.random.normal(next(keys), (hidden_node, H * Fg), F32)
            / jnp.sqrt(jnp.asarray(hidden_node, F32)),
            "al_mat": _block_diag_attn(attn_l),
            "ar_mat": _block_diag_attn(attn_r),
            "gat_bias_flat": (jax.random.normal(next(keys), (H, Fg), F32) * 0.05
                              ).reshape(1, H * Fg),
            "gc": lin(hidden_node, out_net),
            # lin2 reshaped for the Khatri-Rao NNConv formulation
            "w2_kr": w2.reshape(hidden_pin, hidden_net, out_node
                                ).reshape(hidden_pin * hidden_net, out_node),
            "b2_mat": b2.reshape(hidden_net, out_node),
            "nn_bias": jax.random.normal(next(keys), (out_node,), F32) * 0.05,
        }
        params["layers"].append(lp)
    return params


# ----------------------------------------------------------------------------
# HyperGNN2D forward
# ----------------------------------------------------------------------------
def hypergnn2d_forward(params, in_node, in_net, in_pin, grid_adj_mask, graph):
    H, Fg, C = params["grid_heads"], params["grid_feats"], params["grid_channels"]
    assert grid_adj_mask.shape[0] == C

    node_feat = linear(in_node, *params["node_lin"], act="leaky_relu")
    net_feat = linear(in_net, *params["net_lin"], act="leaky_relu")
    pin_feat = linear(in_pin, *params["pin_lin"], act="leaky_relu")

    for lp in params["layers"]:
        # NodeNetGNN 'pinned' (net -> node): split NNConv(mean), lin2 fused.
        msg = edge_messages(graph["G"], pin_feat, net_feat,
                            lp["w2_kr"], lp["b2_mat"])
        node_part = mean_aggregate(graph["agg_mean"], msg, lp["nn_bias"])
        # NodeNetGNN 'pins' (node -> net): GraphConv('both'), xw hoisted once.
        xw = scaled_linear(node_feat, graph["norm_src"], lp["gc"][0])
        new_net_feat = graph_aggregate(graph["B"], xw, graph["norm_dst"],
                                       lp["gc"][1])
        # GridGNN: hoisted projection + flash-streamed GAT + merge node_part.
        zf, el, er = gat_project(node_feat, lp["gat_fc_w"],
                                 lp["al_mat"], lp["ar_mat"])
        node_feat = gat_layer(zf, el.T, er, grid_adj_mask,
                              lp["gat_bias_flat"], node_part,
                              heads=H, fg=Fg, channels=C)
        net_feat = new_net_feat

    return output_head(in_node, node_feat, params["out1a"], params["out1b"],
                       params["out1_b"], params["out2"][0], params["out2"][1],
                       params["out3"][0], params["out3"][1],
                       params["activation"])


# ----------------------------------------------------------------------------
if __name__ == "__main__":
    key = jax.random.PRNGKey(0)
    cfg = dict(N_LAYER=2, NODE_FEATS=8, NET_FEATS=8, GRID_FEATS=4,
               GRID_HEADS=2, GRID_CHANNELS=2, PIN_FEATS=6)
    in_node_feats, in_net_feats, in_pin_feats, n_target = 8, 6, 4, 2
    n_node, n_net, n_pin = 16, 8, 32

    k_in, k_p = jax.random.split(key)
    k1, k2, k3 = jax.random.split(k_in, 3)
    in_node = jax.random.normal(k1, (n_node, in_node_feats), F32)
    in_net = jax.random.normal(k2, (n_net, in_net_feats), F32)
    in_pin = jax.random.normal(k3, (n_pin, in_pin_feats), F32)

    # grid graphs: self-loops + two deterministic ring edges per node/channel.
    def build_grid_adj(n, c):
        idx = jnp.arange(n)
        a = jnp.eye(n, dtype=F32)
        a = a.at[idx, (idx + 1 + c) % n].set(1.0)
        a = a.at[idx, (idx + 3 + 2 * c) % n].set(1.0)
        return a                                               # a[dst, src]

    grid_adj = jnp.stack([build_grid_adj(n_node, c)
                          for c in range(cfg["GRID_CHANNELS"])])
    grid_adj_mask = (1.0 - grid_adj) * _NEG_BIG                # additive mask

    # node<->net hypergraph: deterministic pin list.
    e = jnp.arange(n_pin)
    pin_node = e % n_node
    pin_net = (e % n_net + e // n_node) % n_net

    B = jnp.zeros((n_net, n_node), F32).at[pin_net, pin_node].add(1.0)
    outdeg_node = jnp.maximum(jnp.sum(B, axis=0), 1.0)         # 'pins' src deg
    indeg_net = jnp.maximum(jnp.sum(B, axis=1), 1.0)           # 'pins' dst deg
    norm_src = (outdeg_node ** -0.5).reshape(-1, 1).astype(F32)
    norm_dst = (indeg_net ** -0.5).reshape(-1, 1).astype(F32)
    # 'pinned': per-node mean over incoming pin edges (degree clamped to >= 1).
    onehot_dst = jnp.zeros((n_node, n_pin), F32).at[pin_node, e].set(1.0)
    node_pin_deg = jnp.maximum(jnp.sum(onehot_dst, axis=1, keepdims=True), 1.0)
    agg_mean = onehot_dst / node_pin_deg
    # gather one-hot: pin edge -> its source net.
    G = jnp.zeros((n_pin, n_net), F32).at[e, pin_net].set(1.0)

    graph = dict(B=B, norm_src=norm_src, norm_dst=norm_dst,
                 agg_mean=agg_mean, G=G)

    params = init_params(k_p, cfg, in_node_feats, in_net_feats, in_pin_feats,
                         n_target, activation="sig")

    out = hypergnn2d_forward(params, in_node, in_net, in_pin,
                             grid_adj_mask, graph)
    out = jax.block_until_ready(out)
    assert out.shape == (n_node, n_target), out.shape
    assert bool(jnp.all(jnp.isfinite(out)))
    print("KERNEL_OK")
</pallas_src>

<mosaic_0001>
module attributes {stable_mosaic.version = 11 : i64} {
  func.func @_linear_kernel(%arg0: i32, %arg1: memref<16x8xf32, #tpu.memory_space<vmem>>, %arg2: memref<8x24xf32, #tpu.memory_space<vmem>>, %arg3: memref<1x24xf32, #tpu.memory_space<vmem>>, %arg4: memref<16x24xf32, #tpu.memory_space<vmem>>) attributes {dimension_semantics = [#tpu.dimension_semantics<parallel>], iteration_bounds = array<i64: 1>, scalar_prefetch = 0 : i64, scratch_operands = 0 : i64, tpu.core_type = #tpu.core_type<tc>, window_params = [{transform_indices = @transform_0, window_bounds = array<i64: 16, 8>}, {pipeline_mode = #tpu.pipeline_mode<synchronous>, transform_indices = @transform_1, window_bounds = array<i64: 8, 24>}, {pipeline_mode = #tpu.pipeline_mode<synchronous>, transform_indices = @transform_2, window_bounds = array<i64: 1, 24>}, {transform_indices = @transform_3, window_bounds = array<i64: 16, 24>}]} {
    %c0 = arith.constant 0 : index
    %c0_0 = arith.constant 0 : index
    %0 = vector.load %arg1[%c0, %c0_0] : memref<16x8xf32, #tpu.memory_space<vmem>>, vector<16x8xf32>
    %c0_1 = arith.constant 0 : index
    %c0_2 = arith.constant 0 : index
    %1 = vector.load %arg2[%c0_1, %c0_2] : memref<8x24xf32, #tpu.memory_space<vmem>>, vector<8x24xf32>
    %cst = arith.constant dense<0.000000e+00> : vector<16x24xf32>
    %2 = tpu.matmul %0, %1, %cst {dimension_numbers = #tpu.dot_dimension_numbers<[1], [0], [0], [1], [0, 0, 1, 1], [], []>} : vector<16x8xf32>, vector<8x24xf32>, vector<16x24xf32> -> vector<16x24xf32>
    %c0_3 = arith.constant 0 : index
    %c0_4 = arith.constant 0 : index
    %3 = vector.load %arg3[%c0_3, %c0_4] : memref<1x24xf32, #tpu.memory_space<vmem>>, vector<1x24xf32>
    %4 = vector.broadcast %3 : vector<1x24xf32> to vector<16x24xf32>
    %5 = arith.addf %2, %4 : vector<16x24xf32>
    %cst_5 = arith.constant 0.000000e+00 : f32
    %6 = vector.broadcast %cst_5 : f32 to vector<16x24xf32>
    %7 = arith.cmpf oge, %5, %6 : vector<16x24xf32>
    %cst_6 = arith.constant 0.00999999977 : f32
    %8 = vector.broadcast %cst_6 : f32 to vector<16x24xf32>
    %9 = arith.mulf %8, %5 : vector<16x24xf32>
    %10 = arith.select %7, %5, %9 : vector<16x24xi1>, vector<16x24xf32>
    %c0_7 = arith.constant 0 : index
    %c0_8 = arith.constant 0 : index
    %11 = vector.load %arg4[%c0_7, %c0_8] : memref<16x24xf32, #tpu.memory_space<vmem>>, vector<16x24xf32>
    tpu.vector_store %arg4[%c0_7, %c0_8], %10 {strides = array<i32>} : memref<16x24xf32, #tpu.memory_space<vmem>>, vector<16x24xf32>,
    return
  }
  func.func @transform_0(%arg0: i32) -> (i32, i32) {
    %c0_i32 = arith.constant 0 : i32
    %c0_i32_0 = arith.constant 0 : i32
    return %arg0, %c0_i32 : i32, i32
  }
  func.func @transform_1(%arg0: i32) -> (i32, i32) {
    %c0_i32 = arith.constant 0 : i32
    %c0_i32_0 = arith.constant 0 : i32
    %c0_i32_1 = arith.constant 0 : i32
    return %c0_i32, %c0_i32_0 : i32, i32
  }
  func.func @transform_2(%arg0: i32) -> (i32, i32) {
    %c0_i32 = arith.constant 0 : i32
    %c0_i32_0 = arith.constant 0 : i32
    %c0_i32_1 = arith.constant 0 : i32
    return %c0_i32, %c0_i32_0 : i32, i32
  }
  func.func @transform_3(%arg0: i32) -> (i32, i32) {
    %c0_i32 = arith.constant 0 : i32
    %c0_i32_0 = arith.constant 0 : i32
    return %arg0, %c0_i32 : i32, i32
  }
}

</mosaic_0001>

<bundles_post_ra>
// kernel: tpu_custom_call.1
= control target key start
LH: loop header
LB: loop body
LE: loop exit
PB: predicated region body
PF: predicated region fallthrough
CT: control target
= control target key end

     0   :  { %vm25_vm0 = vcmask 64512   ;;  %s217_s0 = inlined_call_operand.vmem [shape: f32[16,8], index: 0, kind: input, shape index: {}]   ;;  %s218_s1 = inlined_call_operand.vmem [shape: f32[8,24], index: 1, kind: input, shape index: {}]   ;;  %s219_s2 = inlined_call_operand.vmem [shape: f32[1,24], index: 2, kind: input, shape index: {}]   ;;  %s220_s3 = inlined_call_operand.hbm [shape: f32[16,24], index: 3, kind: output, shape index: {}]  }
   0x1   :  { %v17_v0 = vld [vmem:[%s218_s1] sm:$0xff]  ;;  %v16_v2 = vld [vmem:[%s217_s0 + $0x8] sm:$0xff] }
   0x2   :  { %v15_v1 = vld [vmem:[%s217_s0] sm:$0xff]  ;;  %138 = vmatprep.subr.mxu0 %v17_v0 }
   0x3   :  { %140 = vmatprep.mubr.msk.f32.mxu0 %vm25_vm0, %v15_v1 }
   0x4   :  { %8 = vsyncpa [#allocation3], 0  ;;  %139 = vmatpush3.msra.mxu0 %v17_v0  ;;  %v132_v3 = vld [vmem:[%s219_s2] ss:$0 sm:$0xff]  ;;  %s170_s1 = smov [#allocation2]   ;;  %vm113_vm2 = vcmask 195584  }
   0x5   :  { %141 = vmatmul.mubr.msk.f32.vlgmr.msra.gmra.mrb[0].mxu0 %vm25_vm0, %v16_v2  ;;  %s121_s20 = sshll.u32 %s170_s1, 4  ;;  %s122_s20 = int_to_ptr.vmem [resolvable:$true] %s121_s20 }
   0x6   :  { %s146_s0 = scalar_lea.vmem %s122_s20, 256  ;;  %p151_p1 = scmp.lt.s32.totalorder %s122_s20, %s122_s20 }
   0x7   :  { %p147_p0 = scmp.ne.s32.totalorder %s122_s20, %s146_s0  ;;  %p152_p2 = scmp.lt.s32.totalorder %s146_s0, %s146_s0 }
   0x9   :  { %p153_p3 = por %p152_p2, %p151_p1 }
   0xb   :  { %p154_p4 = pnand %p153_p3, %p147_p0 }
  0xd8   :  { %v142_v4 = vpop.f32.mrb[0].mxu0 }
  0xd9   :  { %v104_v5 = vadd.f32 %v142_v4, %v132_v3  ;;  %v98_v6 = vpop.f32.mrb[1].mxu0 }
  0xda   :  { %v99_v7 = vadd.f32 %v132_v3, %v98_v6 }
  0xdb   :  { %vm108_vm1 = vcmp.ge.f32.partialorder %v104_v5, 0.0  ;;  %v110_v8 = vmul.f32 0.01, %v104_v5 }
  0xdc   :  { %vm107_vm3 = vcmp.ge.f32.partialorder %v99_v7, 0.0  ;;  %v109_v9 = vmul.f32 0.01, %v99_v7 }
  0xdd   :  { %v112_v10 = vsel %vm108_vm1, %v104_v5, %v110_v8 }
  0xde   :  { %115 = vst.msk [vmem:[#allocation2 + $0x8] sm:$0xff] %vm113_vm2, %v112_v10  ;;  %v111_v11 = vsel %vm107_vm3, %v99_v7, %v109_v9 }
  0xdf   :  { %114 = vst.msk [vmem:[#allocation2] sm:$0xff] %vm113_vm2, %v111_v11 }
  0xe0   :  { %157 = shalt.err (!%p154_p4)
}
  0xe1   :  { %s158_s22 = scalar_lea.hbm %s220_s3, 256 }
  0xe2   :  { %p159_p5 = scmp.ne.s32.totalorder %s220_s3, %s158_s22  ;;  %p162_p6 = scmp.lt.u32.totalorder %s158_s22, %s220_s3 }
  0xe4   :  { %p164_p7 = pnand %p162_p6, %p159_p5 }
  0xe6   :  { %167 = shalt.err (!%p164_p7)
}
  0xe7   :  { %s171_s27 = smov 128   ;;  %s172_s28 = smov 8  }
  0xe8   :  { %127 = dma.vmem_to_hbm [thread:$0]  %s122_s20, 256, %s220_s3, [#allocation3], %s171_s27, %s171_s27, %s172_s28  }
  0xe9   :  { %168 = dma.done.wait [#allocation3], 256  }
  0xea   :  { %169 = vsyncadd [#allocation3], 4294967040 }
  0xeb   :  { %131 = vsyncpa [#allocation3], 1 }

</bundles_post_ra>
